<compile_context>
chip_gen: v5e
topology: v5e:2x2
jax: 0.10.0
libtpu: 0.0.40
codegen_flags: <defaults>
</compile_context>

<pallas_src>
import jax
import jax.numpy as jnp
from jax.experimental import pallas as pl
from jax.experimental.pallas import tpu as pltpu

NETWORK_CHANNELS = 64
C = NETWORK_CHANNELS
N_OSC = 32                 # OscillatorBank(self.channels, 32, band_size, ...)
LATENT_FRAMES = 32         # ConvUpsample(..., 4, 32, 'fft', ...) -> 32 time frames
N_NOISE_FRAMES = 64        # NoiseModel(..., n_noise_frames=64, ...)
LEAK = 0.2
BAND_OUT = C + 2 * N_OSC   # 128 per band: [h | freq | amp]
# TODO(synk): PsychoacousticFeature.band_sizes not available; use small stand-ins.
BAND_SIZES = [256, 512]
NB = len(BAND_SIZES)
CK = NB * C                # 128 : block-diagonal trunk width
OUT_W = NB * BAND_OUT      # 256 : fused lane-dense output width


# ----------------------------------------------------------------------------
# Pallas kernel: both bands' trunks + (final conv ∘ osc heads), block-diagonal
# ----------------------------------------------------------------------------
def band_trunk_kernel(x_ref, wt_ref, bt_ref, wbig_ref, bbig_ref, out_ref):
    # x_ref: (n, 128) bf16  -- band b's trunk input in lanes [b*64, (b+1)*64)
    h = x_ref[...]
    # for layer in self.t: x = layer(x); x = F.leaky_relu(x, 0.2)   (both bands at once)
    for i in range(4):
        a = jnp.dot(h, wt_ref[i], preferred_element_type=jnp.float32) + bt_ref[i]
        a = jnp.maximum(a, LEAK * a)                 # leaky_relu(0.2)
        h = a.astype(jnp.bfloat16)                   # single cast per layer
    # Fused block-diag head: per band [final | final@freq_head | final@amp_head]
    o = jnp.dot(h, wbig_ref[...], preferred_element_type=jnp.float32) + bbig_ref[...]
    # Per-band 128-lane block: [0,64) identity (final conv out),
    # [64,96) sigmoid (osc freq activation), [96,128) abs (osc amp activation).
    lane = jax.lax.broadcasted_iota(jnp.int32, o.shape, 1) & (BAND_OUT - 1)
    # sigmoid via EUP exp + approx reciprocal (keeps the divide off the VALU)
    sig = pl.reciprocal(1.0 + jnp.exp(-o), approx=True)
    out_ref[...] = jnp.where(lane < C, o,
                             jnp.where(lane < C + N_OSC, sig, jnp.abs(o)))


def band_trunk_fused(x128, wt, bt, wbig, bbig):
    """x128: (N, 128) bf16 with the same (N,64) trunk input replicated per band.

    Returns (N, 256) f32 = per band [h | sigmoid(freq) | abs(amp)]."""
    n = x128.shape[0]
    vmem = lambda: pl.BlockSpec(memory_space=pltpu.MemorySpace.VMEM)
    # Single kernel invocation (no grid): the whole working set is < 1 MB, so
    # extra grid steps / megacore splitting would only add fixed overhead.
    return pl.pallas_call(
        band_trunk_kernel,
        out_shape=jax.ShapeDtypeStruct((n, OUT_W), jnp.float32),
        in_specs=[vmem(), vmem(), vmem(), vmem(), vmem()],
        out_specs=vmem(),
    )(x128, wt, bt, wbig, bbig)


def pack_decoder_params(params):
    """Runs ONCE, outside the jitted forward.

    Stacks both bands' trunk weights into block-diagonal (4,128,128) bf16
    matrices and pre-composes (final conv ∘ freq/amp heads) into one
    block-diagonal (128,256) bf16 fused head.  Biases stay f32."""
    band_keys = sorted(params["bands"].keys())
    wt = jnp.zeros((4, CK, CK), jnp.float32)
    bt = jnp.zeros((4, 1, CK), jnp.float32)
    wbig = jnp.zeros((CK, OUT_W), jnp.float32)
    bbig = jnp.zeros((1, OUT_W), jnp.float32)
    for bi, k in enumerate(band_keys):
        p = params["bands"][k]
        c0, c1 = bi * C, (bi + 1) * C
        o0, o1 = bi * BAND_OUT, (bi + 1) * BAND_OUT
        wt = wt.at[:, c0:c1, c0:c1].set(p["wt"])
        bt = bt.at[:, :, c0:c1].set(p["bt"])
        # (h@Wf + bf)@Wh + bh  ==  h@(Wf@Wh) + (bf@Wh + bh)   (no nonlinearity between)
        wbig = wbig.at[c0:c1, o0:o1].set(jnp.concatenate(
            [p["wfin"], p["wfin"] @ p["wfreq"], p["wfin"] @ p["wamp"]], axis=1))
        bbig = bbig.at[:, o0:o1].set(jnp.concatenate(
            [p["bfin"],
             p["bfin"] @ p["wfreq"] + p["bfreq"],
             p["bfin"] @ p["wamp"] + p["bamp"]], axis=1))
    return dict(
        up=params["up"],
        wt=wt.astype(jnp.bfloat16),        # (4, 128, 128)
        bt=bt,                             # (4, 1, 128)   f32
        wbig=wbig.astype(jnp.bfloat16),    # (128, 256)
        bbig=bbig,                         # (1, 256)      f32
        noise={k: (params["bands"][k]["noise_w"], params["bands"][k]["noise_b"])
               for k in band_keys},
    )


# ----------------------------------------------------------------------------
# Plain-JAX glue for pieces whose source was not provided
# ----------------------------------------------------------------------------
def conv1d(x, w, b, pad=1):
    # x: (B, Cin, T), w: (Cout, Cin, K)
    y = jax.lax.conv_general_dilated(
        x, w, window_strides=(1,), padding=[(pad, pad)],
        dimension_numbers=("NCH", "OIH", "NCH"))
    return y + b[None, :, None]


def fft_upsample(x, factor=2):
    # x: (B, C, T) -> (B, C, T*factor) by zero-padding the rfft spectrum.
    t = x.shape[-1]
    new_t = t * factor
    spec = jnp.fft.rfft(x, axis=-1)
    pad = new_t // 2 + 1 - spec.shape[-1]
    spec = jnp.pad(spec, ((0, 0), (0, 0), (0, pad)))
    return jnp.fft.irfft(spec, n=new_t, axis=-1) * factor


def conv_upsample(x, p):
    # TODO(synk): exact ConvUpsample(..., 'fft') implementation unavailable; stand-in:
    # Linear -> (B, C, 4) -> 3x [fft-upsample x2 -> Conv1d(k=3) -> leaky_relu] -> Conv1d(k=3).
    bb = x.shape[0]
    h = (x @ p["lin_w"] + p["lin_b"]).reshape(bb, C, 4)
    for (wc, bc) in p["convs"]:
        h = fft_upsample(h, 2)
        h = conv1d(h, wc, bc)
        h = jnp.maximum(h, LEAK * h)
    h = conv1d(h, p["out_w"], p["out_b"])
    return h  # (B, C, 32)


def upsample_time(x, new_t):
    # x: (B, T, F) -> (B, new_t, F), linear interpolation along time.
    t = x.shape[1]
    pos = jnp.clip((jnp.arange(new_t) + 0.5) * t / new_t - 0.5, 0.0, t - 1.0)
    lo = jnp.floor(pos).astype(jnp.int32)
    hi = jnp.minimum(lo + 1, t - 1)
    w = (pos - lo)[None, :, None]
    return x[:, lo, :] * (1.0 - w) + x[:, hi, :] * w


def oscillator_bank(freq, amp, band_size, lowest_freq):
    # TODO(synk): OscillatorBank source unavailable; plausible constrained sine bank.
    freq = lowest_freq + freq * (1.0 - lowest_freq)          # constrain=True
    freq_up = upsample_time(freq, band_size)                 # (B, band, N_OSC)
    amp_up = upsample_time(amp, band_size)
    phase = jnp.cumsum(freq_up * jnp.pi, axis=1)
    harm = jnp.sum(jnp.sin(phase) * amp_up, axis=2)
    return harm[:, None, :]                                  # (B, 1, band_size)


def noise_model(h, w, b, band_size, mask_after, key):
    # TODO(synk): NoiseModel source unavailable; plausible framewise spectral-shaping of noise.
    bb = h.shape[0]
    window = band_size // N_NOISE_FRAMES
    n_coeffs = window // 2 + 1
    hf = upsample_time(h, N_NOISE_FRAMES)                    # (B, 64, C)
    spec = hf @ w + b                                        # (B, 64, n_coeffs), activation = identity
    if mask_after is not None:
        spec = spec * (jnp.arange(n_coeffs) < mask_after)
    noise = jax.random.uniform(key, (bb, N_NOISE_FRAMES, window), minval=-1.0, maxval=1.0)
    shaped = jnp.fft.irfft(jnp.fft.rfft(noise, axis=-1) * spec, n=window, axis=-1)
    return shaped.reshape(bb, 1, band_size)


# ----------------------------------------------------------------------------
# Decoder forward (takes pre-packed weights; packing is hoisted out of jit)
# ----------------------------------------------------------------------------
@jax.jit
def decoder_forward(latent, packed, noise_key):
    # latent: (B, 64)
    x = conv_upsample(latent, packed["up"])                  # (B, C, 32)   (NCT)
    x = jnp.transpose(x, (0, 2, 1))                          # Decoder: x.permute(0, 2, 1)
    bb, t, _ = x.shape
    # Both BandUpsample branches receive the SAME x; replicate it lane-dense
    # (band b in lanes [b*64,(b+1)*64)) and pre-cast to bf16 for the MXU.
    x128 = jnp.tile(x.reshape(bb * t, C), (1, NB)).astype(jnp.bfloat16)
    fused = band_trunk_fused(x128, packed["wt"], packed["bt"],
                             packed["wbig"], packed["bbig"])          # (B*t, 256)
    fused = fused.reshape(bb, t, OUT_W)
    out = {}
    for bi, k in enumerate(sorted(packed["noise"].keys())):
        o = fused[:, :, bi * BAND_OUT:(bi + 1) * BAND_OUT]
        h = o[:, :, :C]
        freq = o[:, :, C:C + N_OSC]
        amp = o[:, :, C + N_OSC:]
        lowest = 0.05 if k == 512 else 0.01
        mask_after = 1 if k == 512 else None
        harm = oscillator_bank(freq, amp, k, lowest)
        nw, nb_ = packed["noise"][k]
        noise = noise_model(h, nw, nb_, k, mask_after,
                            jax.random.fold_in(noise_key, k))
        out[int(k)] = (harm, noise)
    return out


# ----------------------------------------------------------------------------
# Deterministic parameter init (stand-in for make_initializer(0.1))
# ----------------------------------------------------------------------------
def init_params(key, scale=0.1):
    keys = iter(jax.random.split(key, 64))
    w = lambda shape: jax.random.normal(next(keys), shape, jnp.float32) * scale
    up = dict(
        lin_w=w((C, C * 4)), lin_b=w((C * 4,)),
        convs=[(w((C, C, 3)), w((C,))) for _ in range(3)],
        out_w=w((C, C, 3)), out_b=w((C,)),
    )
    bands = {}
    for k in BAND_SIZES:
        n_coeffs = (k // N_NOISE_FRAMES) // 2 + 1
        # NOTE: weights are stored (C_in, C_out); a real PyTorch Conv1d-1x1
        # checkpoint ((C_out, C_in, 1)) must be transposed: W[:, :, 0].T
        bands[k] = dict(
            wt=jnp.stack([w((C, C)) for _ in range(4)]),     # (4, C, C)
            bt=jnp.stack([w((1, C)) for _ in range(4)]),     # (4, 1, C)
            wfin=w((C, C)), bfin=w((1, C)),
            wfreq=w((C, N_OSC)), bfreq=w((1, N_OSC)),
            wamp=w((C, N_OSC)), bamp=w((1, N_OSC)),
            noise_w=w((C, n_coeffs)), noise_b=w((n_coeffs,)),
        )
    return dict(up=up, bands=bands)


if __name__ == "__main__":
    key = jax.random.PRNGKey(0)
    pkey, xkey, nkey = jax.random.split(key, 3)
    params = init_params(pkey)
    packed = pack_decoder_params(params)      # runs ONCE, outside the jitted forward

    B = 2
    latent = jax.random.normal(xkey, (B, NETWORK_CHANNELS), dtype=jnp.float32)

    out = decoder_forward(latent, packed, nkey)
    out = jax.block_until_ready(out)

    for k, (harm, noise) in out.items():
        assert harm.shape == (B, 1, k), (k, harm.shape)
        assert noise.shape == (B, 1, k), (k, noise.shape)
        assert harm.dtype == jnp.float32 and noise.dtype == jnp.float32
        assert bool(jnp.all(jnp.isfinite(harm))) and bool(jnp.all(jnp.isfinite(noise)))

    print("KERNEL_OK")
</pallas_src>

<mosaic_0001>
module attributes {stable_mosaic.version = 11 : i64} {
  func.func @band_trunk_kernel(%arg0: memref<64x128xbf16, #tpu.memory_space<vmem>>, %arg1: memref<4x128x128xbf16, #tpu.memory_space<vmem>>, %arg2: memref<4x1x128xf32, #tpu.memory_space<vmem>>, %arg3: memref<128x256xbf16, #tpu.memory_space<vmem>>, %arg4: memref<1x256xf32, #tpu.memory_space<vmem>>, %arg5: memref<64x256xf32, #tpu.memory_space<vmem>>) attributes {dimension_semantics = [], scalar_prefetch = 0 : i64, scratch_operands = 0 : i64, tpu.core_type = #tpu.core_type<tc>} {
    %c0 = arith.constant 0 : index
    %c0_0 = arith.constant 0 : index
    %0 = vector.load %arg0[%c0, %c0_0] : memref<64x128xbf16, #tpu.memory_space<vmem>>, vector<64x128xbf16>
    %c0_1 = arith.constant 0 : index
    %c0_2 = arith.constant 0 : index
    %c0_3 = arith.constant 0 : index
    %1 = vector.load %arg1[%c0_1, %c0_2, %c0_3] : memref<4x128x128xbf16, #tpu.memory_space<vmem>>, vector<1x128x128xbf16>
    %2 = vector.shape_cast %1 : vector<1x128x128xbf16> to vector<128x128xbf16>
    %cst = arith.constant dense<0.000000e+00> : vector<64x128xf32>
    %3 = tpu.matmul %0, %2, %cst {dimension_numbers = #tpu.dot_dimension_numbers<[1], [0], [0], [1], [0, 0, 1, 1], [], []>} : vector<64x128xbf16>, vector<128x128xbf16>, vector<64x128xf32> -> vector<64x128xf32>
    %c0_4 = arith.constant 0 : index
    %c0_5 = arith.constant 0 : index
    %c0_6 = arith.constant 0 : index
    %4 = vector.load %arg2[%c0_4, %c0_5, %c0_6] : memref<4x1x128xf32, #tpu.memory_space<vmem>>, vector<1x1x128xf32>
    %5 = vector.shape_cast %4 : vector<1x1x128xf32> to vector<1x128xf32>
    %6 = vector.broadcast %5 : vector<1x128xf32> to vector<64x128xf32>
    %7 = arith.addf %3, %6 : vector<64x128xf32>
    %cst_7 = arith.constant 2.000000e-01 : f32
    %8 = vector.broadcast %cst_7 : f32 to vector<64x128xf32>
    %9 = arith.mulf %8, %7 : vector<64x128xf32>
    %10 = arith.maximumf %7, %9 : vector<64x128xf32>
    %11 = arith.truncf %10 : vector<64x128xf32> to vector<64x128xbf16>
    %c1 = arith.constant 1 : index
    %c0_8 = arith.constant 0 : index
    %c0_9 = arith.constant 0 : index
    %12 = vector.load %arg1[%c1, %c0_8, %c0_9] : memref<4x128x128xbf16, #tpu.memory_space<vmem>>, vector<1x128x128xbf16>
    %13 = vector.shape_cast %12 : vector<1x128x128xbf16> to vector<128x128xbf16>
    %cst_10 = arith.constant dense<0.000000e+00> : vector<64x128xf32>
    %14 = tpu.matmul %11, %13, %cst_10 {dimension_numbers = #tpu.dot_dimension_numbers<[1], [0], [0], [1], [0, 0, 1, 1], [], []>} : vector<64x128xbf16>, vector<128x128xbf16>, vector<64x128xf32> -> vector<64x128xf32>
    %c1_11 = arith.constant 1 : index
    %c0_12 = arith.constant 0 : index
    %c0_13 = arith.constant 0 : index
    %15 = vector.load %arg2[%c1_11, %c0_12, %c0_13] : memref<4x1x128xf32, #tpu.memory_space<vmem>>, vector<1x1x128xf32>
    %16 = vector.shape_cast %15 : vector<1x1x128xf32> to vector<1x128xf32>
    %17 = vector.broadcast %16 : vector<1x128xf32> to vector<64x128xf32>
    %18 = arith.addf %14, %17 : vector<64x128xf32>
    %cst_14 = arith.constant 2.000000e-01 : f32
    %19 = vector.broadcast %cst_14 : f32 to vector<64x128xf32>
    %20 = arith.mulf %19, %18 : vector<64x128xf32>
    %21 = arith.maximumf %18, %20 : vector<64x128xf32>
    %22 = arith.truncf %21 : vector<64x128xf32> to vector<64x128xbf16>
    %c2 = arith.constant 2 : index
    %c0_15 = arith.constant 0 : index
    %c0_16 = arith.constant 0 : index
    %23 = vector.load %arg1[%c2, %c0_15, %c0_16] : memref<4x128x128xbf16, #tpu.memory_space<vmem>>, vector<1x128x128xbf16>
    %24 = vector.shape_cast %23 : vector<1x128x128xbf16> to vector<128x128xbf16>
    %cst_17 = arith.constant dense<0.000000e+00> : vector<64x128xf32>
    %25 = tpu.matmul %22, %24, %cst_17 {dimension_numbers = #tpu.dot_dimension_numbers<[1], [0], [0], [1], [0, 0, 1, 1], [], []>} : vector<64x128xbf16>, vector<128x128xbf16>, vector<64x128xf32> -> vector<64x128xf32>
    %c2_18 = arith.constant 2 : index
    %c0_19 = arith.constant 0 : index
    %c0_20 = arith.constant 0 : index
    %26 = vector.load %arg2[%c2_18, %c0_19, %c0_20] : memref<4x1x128xf32, #tpu.memory_space<vmem>>, vector<1x1x128xf32>
    %27 = vector.shape_cast %26 : vector<1x1x128xf32> to vector<1x128xf32>
    %28 = vector.broadcast %27 : vector<1x128xf32> to vector<64x128xf32>
    %29 = arith.addf %25, %28 : vector<64x128xf32>
    %cst_21 = arith.constant 2.000000e-01 : f32
    %30 = vector.broadcast %cst_21 : f32 to vector<64x128xf32>
    %31 = arith.mulf %30, %29 : vector<64x128xf32>
    %32 = arith.maximumf %29, %31 : vector<64x128xf32>
    %33 = arith.truncf %32 : vector<64x128xf32> to vector<64x128xbf16>
    %c3 = arith.constant 3 : index
    %c0_22 = arith.constant 0 : index
    %c0_23 = arith.constant 0 : index
    %34 = vector.load %arg1[%c3, %c0_22, %c0_23] : memref<4x128x128xbf16, #tpu.memory_space<vmem>>, vector<1x128x128xbf16>
    %35 = vector.shape_cast %34 : vector<1x128x128xbf16> to vector<128x128xbf16>
    %cst_24 = arith.constant dense<0.000000e+00> : vector<64x128xf32>
    %36 = tpu.matmul %33, %35, %cst_24 {dimension_numbers = #tpu.dot_dimension_numbers<[1], [0], [0], [1], [0, 0, 1, 1], [], []>} : vector<64x128xbf16>, vector<128x128xbf16>, vector<64x128xf32> -> vector<64x128xf32>
    %c3_25 = arith.constant 3 : index
    %c0_26 = arith.constant 0 : index
    %c0_27 = arith.constant 0 : index
    %37 = vector.load %arg2[%c3_25, %c0_26, %c0_27] : memref<4x1x128xf32, #tpu.memory_space<vmem>>, vector<1x1x128xf32>
    %38 = vector.shape_cast %37 : vector<1x1x128xf32> to vector<1x128xf32>
    %39 = vector.broadcast %38 : vector<1x128xf32> to vector<64x128xf32>
    %40 = arith.addf %36, %39 : vector<64x128xf32>
    %cst_28 = arith.constant 2.000000e-01 : f32
    %41 = vector.broadcast %cst_28 : f32 to vector<64x128xf32>
    %42 = arith.mulf %41, %40 : vector<64x128xf32>
    %43 = arith.maximumf %40, %42 : vector<64x128xf32>
    %44 = arith.truncf %43 : vector<64x128xf32> to vector<64x128xbf16>
    %c0_29 = arith.constant 0 : index
    %c0_30 = arith.constant 0 : index
    %45 = vector.load %arg3[%c0_29, %c0_30] : memref<128x256xbf16, #tpu.memory_space<vmem>>, vector<128x256xbf16>
    %cst_31 = arith.constant dense<0.000000e+00> : vector<64x256xf32>
    %46 = tpu.matmul %44, %45, %cst_31 {dimension_numbers = #tpu.dot_dimension_numbers<[1], [0], [0], [1], [0, 0, 1, 1], [], []>} : vector<64x128xbf16>, vector<128x256xbf16>, vector<64x256xf32> -> vector<64x256xf32>
    %c0_32 = arith.constant 0 : index
    %c0_33 = arith.constant 0 : index
    %47 = vector.load %arg4[%c0_32, %c0_33] : memref<1x256xf32, #tpu.memory_space<vmem>>, vector<1x256xf32>
    %48 = vector.broadcast %47 : vector<1x256xf32> to vector<64x256xf32>
    %49 = arith.addf %46, %48 : vector<64x256xf32>
    %50 = tpu.iota {dimensions = array<i32: 1>} : vector<64x256xi32>
    %c127_i32 = arith.constant 127 : i32
    %51 = vector.broadcast %c127_i32 : i32 to vector<64x256xi32>
    %52 = arith.andi %50, %51 : vector<64x256xi32>
    %cst_34 = arith.constant 0.000000e+00 : f32
    %53 = vector.broadcast %cst_34 : f32 to vector<64x256xf32>
    %54 = arith.subf %53, %49 : vector<64x256xf32>
    %55 = math.exp %54 : vector<64x256xf32>
    %cst_35 = arith.constant 1.000000e+00 : f32
    %56 = vector.broadcast %cst_35 : f32 to vector<64x256xf32>
    %57 = arith.addf %56, %55 : vector<64x256xf32>
    %58 = tpu.reciprocal %57 {approx = true} : vector<64x256xf32> -> vector<64x256xf32>
    %c64_i32 = arith.constant 64 : i32
    %59 = vector.broadcast %c64_i32 : i32 to vector<64x256xi32>
    %60 = arith.cmpi slt, %52, %59 : vector<64x256xi32>
    %c96_i32 = arith.constant 96 : i32
    %61 = vector.broadcast %c96_i32 : i32 to vector<64x256xi32>
    %62 = arith.cmpi slt, %52, %61 : vector<64x256xi32>
    %63 = math.absf %49 : vector<64x256xf32>
    %64 = arith.select %62, %58, %63 : vector<64x256xi1>, vector<64x256xf32>
    %65 = arith.select %60, %49, %64 : vector<64x256xi1>, vector<64x256xf32>
    %c0_36 = arith.constant 0 : index
    %c0_37 = arith.constant 0 : index
    %66 = vector.load %arg5[%c0_36, %c0_37] : memref<64x256xf32, #tpu.memory_space<vmem>>, vector<64x256xf32>
    tpu.vector_store %arg5[%c0_36, %c0_37], %65 {strides = array<i32>} : memref<64x256xf32, #tpu.memory_space<vmem>>, vector<64x256xf32>,
    return
  }
}

</mosaic_0001>

<bundles_post_ra>
// kernel: reverse.11
= control target key start
LH: loop header
LB: loop body
LE: loop exit
PB: predicated region body
PF: predicated region fallthrough
CT: control target
= control target key end

     0   :  { %v55_v2 = vld [vmem:[#allocation1 + $0x8] sm:$0xf]  ;;  %v62_v3 = vld [vmem:[#allocation1] sm:$0xf]  ;;  %v72_v5 = vlaneseq  ;;  %s178_s0 = inlined_call_operand.vmem [shape: f32[2,64,3], index: 0, kind: input, shape index: {}]   ;;  %s179_s1 = inlined_call_operand.vmem [shape: f32[2,64,3], index: 1, kind: output, shape index: {}]  }
   0x1   :  { %v19_v0 = vld [vmem:[%s178_s0] sm:$0xf]  ;;  %v21_v1 = vld [vmem:[%s178_s0 + $0x4] sm:$0xf]  ;;  %57 = vst [vmem:[#allocation0 + $0x10] sm:$0xf] %v55_v2 }
   0x2   :  { %20 = vst [vmem:[#allocation1 + $0x4] sm:$0xf] %v19_v0  ;;  %v73_v11 = vshrl.u32 %v72_v5, 7 }
   0x3   :  { %22 = vst [vmem:[#allocation1 + $0xc] sm:$0xf] %v21_v1 }
   0x4   :  { %63 = vst [vmem:[#allocation0] sm:$0xf] %v62_v3  ;;  %vm74_vm0 = vcmp.lt.s32.totalorder %v73_v11, 3 }
   0x8   :  { %v79_v7 = vld [vmem:[#allocation0 + $0x17] ss:$-1 sm:$0xff] }
   0x9   :  { %v59_v4 = vld [vmem:[#allocation1 + $0x4] sm:$0xf]  ;;  %v80_v9 = vrot.slane %v79_v7, 5 }
   0xa   :  { %v51_v6 = vld [vmem:[#allocation1 + $0xc] sm:$0xf]  ;;  %61 = vst [vmem:[#allocation0 + $0x8] sm:$0xf] %v59_v4 }
   0xb   :  { %53 = vst [vmem:[#allocation0 + $0x18] sm:$0xf] %v51_v6  ;;  %v65_v8 = vld [vmem:[#allocation0 + $0x7] ss:$-1 sm:$0xff] }
   0xc   :  { %v66_v10 = vrot.slane %v65_v8, 5  ;;  %81 = vst [vmem:[#allocation2 + $0x8] sm:$0xff] %v80_v9 }
   0xe   :  { %67 = vst [vmem:[#allocation2] sm:$0xff] %v66_v10 }
  0x11   :  { %v70_v12 = vld [vmem:[#allocation0 + $0xf] ss:$-1 sm:$0xff] }
  0x12   :  { %v71_v13 = vrot.slane %v70_v12, 5  ;;  %v84_v14 = vld [vmem:[#allocation0 + $0x1f] ss:$-1 sm:$0xff] }
  0x13   :  { %v85_v15 = vrot.slane %v84_v14, 5 }
  0x14   :  { %75 = vst.msk [vmem:[#allocation2] sm:$0xff] %vm74_vm0, %v71_v13 }
  0x15   :  { %89 = vst.msk [vmem:[#allocation2 + $0x8] sm:$0xff] %vm74_vm0, %v85_v15 }
  0x1b   :  { %v92_v16 = vld [vmem:[#allocation2] sm:$0xf] }
  0x1c   :  { %95 = vst [vmem:[#allocation3] sm:$0xf] %v92_v16  ;;  %v97_v17 = vld [vmem:[#allocation2 + $0x8] sm:$0xf] }
  0x1d   :  { %101 = vst [vmem:[#allocation3 + $0x4] sm:$0xf] %v97_v17 }
  0x24   :  { %v118_v18 = vld [vmem:[#allocation3] sm:$0xff]  }
  0x25   :  { %119 = vst [vmem:[%s179_s1] sm:$0xff] %v118_v18  }

// kernel: reverse.2
= control target key start
LH: loop header
LB: loop body
LE: loop exit
PB: predicated region body
PF: predicated region fallthrough
CT: control target
= control target key end

     0   :  { %v41_v2 = vld [vmem:[#allocation0 + $0x7] ss:$-1 sm:$0xff]  ;;  %v48_v3 = vlaneseq  ;;  %v55_v5 = vld [vmem:[#allocation0 + $0x17] ss:$-1 sm:$0xff]  ;;  %s137_s0 = inlined_call_operand.vmem [shape: f32[2,64,7], index: 0, kind: input, shape index: {}]   ;;  %s138_s1 = inlined_call_operand.vmem [shape: f32[2,64,7], index: 1, kind: output, shape index: {}]  }
   0x1   :  { %v33_v0 = vld [vmem:[%s137_s0] sm:$0xff]  ;;  %v35_v1 = vld [vmem:[%s137_s0 + $0x8] sm:$0xff]  ;;  %v42_v4 = vrot.slane %v41_v2, 1  ;;  %v56_v6 = vrot.slane %v55_v5, 1 }
   0x2   :  { %34 = vst [vmem:[#allocation0 + $0x8] sm:$0xff] %v33_v0  ;;  %v49_v7 = vshrl.u32 %v48_v3, 7 }
   0x3   :  { %36 = vst [vmem:[#allocation0 + $0x18] sm:$0xff] %v35_v1 }
   0x4   :  { %43 = vst [vmem:[#allocation1] sm:$0xff] %v42_v4  ;;  %vm50_vm0 = vcmp.lt.s32.totalorder %v49_v7, 7 }
   0x5   :  { %57 = vst [vmem:[#allocation1 + $0x8] sm:$0xff] %v56_v6 }
   0x9   :  { %v46_v8 = vld [vmem:[#allocation0 + $0xf] ss:$-1 sm:$0xff] }
   0xa   :  { %v47_v9 = vrot.slane %v46_v8, 1  ;;  %v60_v10 = vld [vmem:[#allocation0 + $0x1f] ss:$-1 sm:$0xff] }
   0xb   :  { %v61_v11 = vrot.slane %v60_v10, 1 }
   0xc   :  { %51 = vst.msk [vmem:[#allocation1] sm:$0xff] %vm50_vm0, %v47_v9 }
   0xd   :  { %65 = vst.msk [vmem:[#allocation1 + $0x8] sm:$0xff] %vm50_vm0, %v61_v11 }
  0x13   :  { %v96_v12 = vld [vmem:[#allocation1] sm:$0xff] }
  0x14   :  { %97 = vst [vmem:[%s138_s1] sm:$0xff] %v96_v12  ;;  %v98_v13 = vld [vmem:[#allocation1 + $0x8] sm:$0xff] }
  0x15   :  { %99 = vst [vmem:[%s138_s1 + $0x8] sm:$0xff] %v98_v13 }

// kernel: reverse.3
= control target key start
LH: loop header
LB: loop body
LE: loop exit
PB: predicated region body
PF: predicated region fallthrough
CT: control target
= control target key end

     0   :  { %v57_v4 = vlaneseq  ;;  %v63_v5 = vld [vmem:[#allocation0 + $0x7] ss:$-1 sm:$0xff]  ;;  %v91_v6 = vld [vmem:[#allocation0 + $0x1f] ss:$-1 sm:$0xff]  ;;  %s200_s0 = inlined_call_operand.vmem [shape: f32[2,64,15], index: 0, kind: input, shape index: {}]   ;;  %s201_s1 = inlined_call_operand.vmem [shape: f32[2,64,15], index: 1, kind: output, shape index: {}]  }
   0x1   :  { %v37_v0 = vld [vmem:[%s200_s0] sm:$0xff]  ;;  %v39_v1 = vld [vmem:[%s200_s0 + $0x8] sm:$0xff]  ;;  %v41_v2 = vld [vmem:[%s200_s0 + $0x10] sm:$0xff]  ;;  %v64_v7 = vrot.slane %v63_v5, 1  ;;  %v92_v8 = vrot.slane %v91_v6, 1 }
   0x2   :  { %38 = vst [vmem:[#allocation0 + $0x8] sm:$0xff] %v37_v0  ;;  %v43_v3 = vld [vmem:[%s200_s0 + $0x18] sm:$0xff]  ;;  %v58_v9 = vshrl.u32 %v57_v4, 7 }
   0x3   :  { %40 = vst [vmem:[#allocation0 + $0x10] sm:$0xff] %v39_v1 }
   0x4   :  { %42 = vst [vmem:[#allocation0 + $0x20] sm:$0xff] %v41_v2  ;;  %vm59_vm0 = vcmp.lt.s32.totalorder %v58_v9, 7 }
   0x5   :  { %44 = vst [vmem:[#allocation0 + $0x28] sm:$0xff] %v43_v3 }
   0x6   :  { %65 = vst [vmem:[#allocation1 + $0x8] sm:$0xff] %v64_v7 }
   0x7   :  { %93 = vst [vmem:[#allocation1 + $0x18] sm:$0xff] %v92_v8 }
   0x9   :  { %v50_v10 = vld [vmem:[#allocation0 + $0xf] ss:$-1 sm:$0xff] }
   0xa   :  { %v68_v11 = vld [vmem:[#allocation0 + $0xf] ss:$-1 sm:$0xff]  ;;  %v51_v12 = vrot.slane %v50_v10, 1  ;;  %v55_v13 = vld [vmem:[#allocation0 + $0x17] ss:$-1 sm:$0xff] }
   0xb   :  { %v69_v14 = vrot.slane %v68_v11, 1  ;;  %v56_v15 = vrot.slane %v55_v13, 1  ;;  %v78_v16 = vld [vmem:[#allocation0 + $0x27] ss:$-1 sm:$0xff] }
   0xc   :  { %v96_v17 = vld [vmem:[#allocation0 + $0x27] ss:$-1 sm:$0xff]  ;;  %52 = vst [vmem:[#allocation1] sm:$0xff] %v51_v12  ;;  %v79_v18 = vrot.slane %v78_v16, 1  ;;  %v83_v19 = vld [vmem:[#allocation0 + $0x2f] ss:$-1 sm:$0xff] }
   0xd   :  { %60 = vst.msk [vmem:[#allocation1] sm:$0xff] %vm59_vm0, %v56_v15  ;;  %v84_v20 = vrot.slane %v83_v19, 1  ;;  %v97_v21 = vrot.slane %v96_v17, 1 }
   0xe   :  { %73 = vst.msk [vmem:[#allocation1 + $0x8] sm:$0xff] %vm59_vm0, %v69_v14 }
   0xf   :  { %80 = vst [vmem:[#allocation1 + $0x10] sm:$0xff] %v79_v18 }
  0x10   :  { %88 = vst.msk [vmem:[#allocation1 + $0x10] sm:$0xff] %vm59_vm0, %v84_v20 }
  0x11   :  { %101 = vst.msk [vmem:[#allocation1 + $0x18] sm:$0xff] %vm59_vm0, %v97_v21 }
  0x14   :  { %v136_v22 = vld [vmem:[#allocation1] sm:$0xff] }
  0x15   :  { %137 = vst [vmem:[%s201_s1] sm:$0xff] %v136_v22  ;;  %v138_v23 = vld [vmem:[#allocation1 + $0x8] sm:$0xff] }
  0x16   :  { %139 = vst [vmem:[%s201_s1 + $0x8] sm:$0xff] %v138_v23 }
  0x17   :  { %v140_v24 = vld [vmem:[#allocation1 + $0x10] sm:$0xff] }
  0x18   :  { %141 = vst [vmem:[%s201_s1 + $0x10] sm:$0xff] %v140_v24  ;;  %v142_v25 = vld [vmem:[#allocation1 + $0x18] sm:$0xff] }
  0x19   :  { %143 = vst [vmem:[%s201_s1 + $0x18] sm:$0xff] %v142_v25 }

// kernel: decoder_forward.1
= control target key start
LH: loop header
LB: loop body
LE: loop exit
PB: predicated region body
PF: predicated region fallthrough
CT: control target
= control target key end

     0   :  { %s1697_s1 = inlined_call_operand.vmem [shape: bf16[4,128,128], index: 1, kind: input, shape index: {}]   ;;  %s1698_s2 = inlined_call_operand.vmem [shape: f32[4,1,128], index: 2, kind: input, shape index: {}]   ;;  %s1699_s0 = inlined_call_operand.vmem [shape: bf16[64,128], index: 0, kind: input, shape index: {}]   ;;  %s1700_s3 = inlined_call_operand.vmem [shape: bf16[128,256], index: 3, kind: input, shape index: {}]   ;;  %s1701_s4 = inlined_call_operand.vmem [shape: f32[1,256], index: 4, kind: input, shape index: {}]   ;;  %s1702_s5 = inlined_call_operand.vmem [shape: f32[64,256], index: 5, kind: output, shape index: {}]  }
   0x1   :  { %v1113_v0 = vld [vmem:[%s1697_s1 + $0x38] sm:$0xff]  ;;  %v1112_v1 = vld [vmem:[%s1697_s1 + $0x30] sm:$0xff]  ;;  %v1111_v2 = vld [vmem:[%s1697_s1 + $0x28] sm:$0xff] }
   0x2   :  { %120 = vmatpush.bf16.msra.mxu0 %v1113_v0  ;;  %1154 = vmatpush.bf16.msra.mxu2 %v1113_v0  ;;  %v1110_v3 = vld [vmem:[%s1697_s1 + $0x20] sm:$0xff]  ;;  %v1109_v4 = vld [vmem:[%s1697_s1 + $0x18] sm:$0xff]  ;;  %v1108_v6 = vld [vmem:[%s1697_s1 + $0x10] sm:$0xff] }
   0x3   :  { %v1121_v5 = vld [vmem:[%s1697_s1 + $0x78] sm:$0xff]  ;;  %v1120_v7 = vld [vmem:[%s1697_s1 + $0x70] sm:$0xff]  ;;  %v1107_v8 = vld [vmem:[%s1697_s1 + $0x8] sm:$0xff] }
   0x4   :  { %239 = vmatpush.bf16.msra.mxu1 %v1121_v5  ;;  %1162 = vmatpush.bf16.msra.mxu3 %v1121_v5  ;;  %v1119_v9 = vld [vmem:[%s1697_s1 + $0x68] sm:$0xff]  ;;  %v1106_v10 = vld [vmem:[%s1697_s1] sm:$0xff]  ;;  %v1104_v13 = vld [vmem:[%s1699_s0 + $0x10] sm:$0xff] }
   0x5   :  { %v1118_v11 = vld [vmem:[%s1697_s1 + $0x60] sm:$0xff]  ;;  %v1103_v14 = vld [vmem:[%s1699_s0 + $0x8] sm:$0xff]  ;;  %v1105_v15 = vld [vmem:[%s1699_s0 + $0x18] sm:$0xff] }
   0x6   :  { %121 = vmatpush.bf16.msra.mxu0 %v1112_v1  ;;  %1155 = vmatpush.bf16.msra.mxu2 %v1112_v1  ;;  %v1102_v12 = vld [vmem:[%s1699_s0] sm:$0xff]  ;;  %v1117_v16 = vld [vmem:[%s1697_s1 + $0x58] sm:$0xff]  ;;  %v1116_v17 = vld [vmem:[%s1697_s1 + $0x50] sm:$0xff] }
   0x7   :  { %v1115_v18 = vld [vmem:[%s1697_s1 + $0x48] sm:$0xff]  ;;  %v1114_v19 = vld [vmem:[%s1697_s1 + $0x40] sm:$0xff]  ;;  %v1129_v24 = vld [vmem:[%s1697_s1 + $0xb8] sm:$0xff] }
   0x8   :  { %240 = vmatpush.bf16.msra.mxu1 %v1120_v7  ;;  %1163 = vmatpush.bf16.msra.mxu3 %v1120_v7  ;;  %v1170_v21 = vld [vmem:[%s1698_s2] ss:$0 sm:$0xff]  ;;  %v1128_v29 = vld [vmem:[%s1697_s1 + $0xb0] sm:$0xff]  ;;  %v1127_v34 = vld [vmem:[%s1697_s1 + $0xa8] sm:$0xff] }
   0x9   :  { %v1126_v41 = vld [vmem:[%s1697_s1 + $0xa0] sm:$0xff]  ;;  %v1125_v61 = vld [vmem:[%s1697_s1 + $0x98] sm:$0xff]  ;;  %v1124_v62 = vld [vmem:[%s1697_s1 + $0x90] sm:$0xff] }
   0xa   :  { %122 = vmatpush.bf16.msra.mxu0 %v1111_v2  ;;  %1156 = vmatpush.bf16.msra.mxu2 %v1111_v2  ;;  %v1123_v63 = vld [vmem:[%s1697_s1 + $0x88] sm:$0xff]  ;;  %v1122_v0 = vld [vmem:[%s1697_s1 + $0x80] sm:$0xff] }
   0xb   :  { %v1171_v2 = vld [vmem:[%s1698_s2 + $0x1] ss:$0 sm:$0xff] }
   0xc   :  { %241 = vmatpush.bf16.msra.mxu1 %v1119_v9  ;;  %1164 = vmatpush.bf16.msra.mxu3 %v1119_v9 }
   0xe   :  { %123 = vmatpush.bf16.msra.mxu0 %v1110_v3  ;;  %1157 = vmatpush.bf16.msra.mxu2 %v1110_v3 }
  0x10   :  { %242 = vmatpush.bf16.msra.mxu1 %v1118_v11  ;;  %1165 = vmatpush.bf16.msra.mxu3 %v1118_v11 }
  0x12   :  { %124 = vmatpush.bf16.msra.mxu0 %v1109_v4  ;;  %1158 = vmatpush.bf16.msra.mxu2 %v1109_v4 }
  0x14   :  { %243 = vmatpush.bf16.msra.mxu1 %v1117_v16  ;;  %1166 = vmatpush.bf16.msra.mxu3 %v1117_v16 }
  0x16   :  { %125 = vmatpush.bf16.msra.mxu0 %v1108_v6  ;;  %1159 = vmatpush.bf16.msra.mxu2 %v1108_v6 }
  0x18   :  { %244 = vmatpush.bf16.msra.mxu1 %v1116_v17  ;;  %1167 = vmatpush.bf16.msra.mxu3 %v1116_v17 }
  0x1a   :  { %126 = vmatpush.bf16.msra.mxu0 %v1107_v8  ;;  %1160 = vmatpush.bf16.msra.mxu2 %v1107_v8 }
  0x1c   :  { %245 = vmatpush.bf16.msra.mxu1 %v1115_v18  ;;  %1168 = vmatpush.bf16.msra.mxu3 %v1115_v18 }
  0x1e   :  { %127 = vmatpush.bf16.msra.mxu0 %v1106_v10  ;;  %1161 = vmatpush.bf16.msra.mxu2 %v1106_v10 }
  0x20   :  { %246 = vmatpush.bf16.msra.mxu1 %v1114_v19  ;;  %1169 = vmatpush.bf16.msra.mxu3 %v1114_v19 }
  0x21   :  { %128 = vmatmul.bf16.vlgmr.msra.gmra.mxu0 %v1102_v12  ;;  %138 = vmatmul.bf16.vlgmr.msra.gmra.mxu2 %v1104_v13 }
  0x22   :  { %358 = vmatpush.bf16.msrb.mxu2 %v1129_v24 }
  0x26   :  { %359 = vmatpush.bf16.msrb.mxu2 %v1128_v29  ;;  %v1135_v29 = vld [vmem:[%s1697_s1 + $0xe8] sm:$0xff] }
  0x2a   :  { %360 = vmatpush.bf16.msrb.mxu2 %v1127_v34 }
  0x2e   :  { %361 = vmatpush.bf16.msrb.mxu2 %v1126_v41 }
  0x31   :  { %133 = vmatmul.bf16.gmra.mxu0 %v1103_v14  ;;  %143 = vmatmul.bf16.gmra.mxu2 %v1105_v15 }
  0x32   :  { %362 = vmatpush.bf16.msrb.mxu2 %v1125_v61 }
  0x36   :  { %363 = vmatpush.bf16.msrb.mxu2 %v1124_v62 }
  0x3a   :  { %364 = vmatpush.bf16.msrb.mxu2 %v1123_v63 }
  0x3e   :  { %365 = vmatpush.bf16.msrb.mxu2 %v1122_v0 }
  0x9e   :  { %v129_v20 = vpop.f32.mrf.mxu0 }
  0x9f   :  { %v130_v22 = vadd.f32 %v1170_v21, %v129_v20 }
  0xa1   :  { %v149_v26 = vmul.f32 0.2, %v130_v22 }
  0xa3   :  { %v157_v31 = vmax.f32 %v130_v22, %v149_v26  ;;  %v1137_v22 = vld [vmem:[%s1697_s1 + $0xf8] sm:$0xff] }
  0xa4   :  { %v139_v23 = vpop.f32.mrf.mxu2  ;;  %477 = vmatpush.bf16.msrb.mxu3 %v1137_v22 }
  0xa5   :  { %v140_v27 = vadd.f32 %v1170_v21, %v139_v23 }
  0xa6   :  { %v131_v25 = vpop.f32.mrf.mxu0 }
  0xa7   :  { %v132_v28 = vadd.f32 %v1170_v21, %v131_v25  ;;  %v153_v32 = vmul.f32 0.2, %v140_v27  ;;  %v1136_v25 = vld [vmem:[%s1697_s1 + $0xf0] sm:$0xff] }
  0xa8   :  { %478 = vmatpush.bf16.msrb.mxu3 %v1136_v25  ;;  %v1147_v25 = vld [vmem:[%s1700_s3 + $0x44] sm:$0xf0] }
  0xa9   :  { %v150_v30 = vmul.f32 0.2, %v132_v28  ;;  %v161_v39 = vmax.f32 %v140_v27, %v153_v32  ;;  %v1134_v32 = vld [vmem:[%s1697_s1 + $0xe0] sm:$0xff] }
  0xab   :  { %v158_v33 = vmax.f32 %v132_v28, %v150_v30 }
  0xac   :  { %v141_v35 = vpop.f32.mrf.mxu2  ;;  %479 = vmatpush.bf16.msrb.mxu3 %v1135_v29 }
  0xad   :  { %v142_v36 = vadd.f32 %v1170_v21, %v141_v35  ;;  %v165_v37 = vpack.c.bf16 %v158_v33, %v157_v31 }
  0xae   :  { %v134_v38 = vpop.f32.mrf.mxu0 }
  0xaf   :  { %v154_v40 = vmul.f32 0.2, %v142_v36  ;;  %247 = vmatmul.bf16.vlgmr.msra.gmra.mxu1 %v165_v37  ;;  %v135_v43 = vadd.f32 %v1170_v21, %v134_v38 }
  0xb0   :  { %480 = vmatpush.bf16.msrb.mxu3 %v1134_v32 }
  0xb1   :  { %v162_v42 = vmax.f32 %v142_v36, %v154_v40  ;;  %v151_v47 = vmul.f32 0.2, %v135_v43 }
  0xb3   :  { %v167_v44 = vpack.c.bf16 %v162_v42, %v161_v39  ;;  %v159_v51 = vmax.f32 %v135_v43, %v151_v47  ;;  %v1133_v42 = vld [vmem:[%s1697_s1 + $0xd8] sm:$0xff]  ;;  %v1132_v43 = vld [vmem:[%s1697_s1 + $0xd0] sm:$0xff]  ;;  %v1385_v47 = vld [vmem:[%s1698_s2 + $0x2] ss:$0 sm:$0xff] }
  0xb4   :  { %v144_v45 = vpop.f32.mrf.mxu2  ;;  %481 = vmatpush.bf16.msrb.mxu3 %v1133_v42 }
  0xb5   :  { %257 = vmatmul.bf16.vlgmr.msra.gmra.mxu3 %v167_v44  ;;  %v145_v48 = vadd.f32 %v1170_v21, %v144_v45  ;;  %v1131_v44 = vld [vmem:[%s1697_s1 + $0xc8] sm:$0xff]  ;;  %v1130_v45 = vld [vmem:[%s1697_s1 + $0xc0] sm:$0xff] }
  0xb6   :  { %v136_v46 = vpop.f32.mrf.mxu0 }
  0xb7   :  { %v137_v49 = vadd.f32 %v1170_v21, %v136_v46  ;;  %v155_v52 = vmul.f32 0.2, %v145_v48 }
  0xb8   :  { %482 = vmatpush.bf16.msrb.mxu3 %v1132_v43  ;;  %v1064_v43 = vld [vmem:[%s1700_s3 + $0x30] sm:$0xf] }
  0xb9   :  { %v152_v50 = vmul.f32 0.2, %v137_v49  ;;  %v163_v57 = vmax.f32 %v145_v48, %v155_v52 }
  0xbb   :  { %v160_v53 = vmax.f32 %v137_v49, %v152_v50 }
  0xbc   :  { %v146_v54 = vpop.f32.mrf.mxu2  ;;  %483 = vmatpush.bf16.msrb.mxu3 %v1131_v44  ;;  %v1145_v44 = vld [vmem:[%s1700_s3 + $0x34] sm:$0xf0] }
  0xbd   :  { %v147_v55 = vadd.f32 %v1170_v21, %v146_v54  ;;  %v166_v56 = vpack.c.bf16 %v160_v53, %v159_v51 }
  0xbf   :  { %v156_v58 = vmul.f32 0.2, %v147_v55  ;;  %252 = vmatmul.bf16.gmra.mxu1 %v166_v56 }
  0xc0   :  { %484 = vmatpush.bf16.msrb.mxu3 %v1130_v45  ;;  %v1144_v45 = vld [vmem:[%s1700_s3 + $0x34] sm:$0xf] }
  0xc1   :  { %v164_v59 = vmax.f32 %v147_v55, %v156_v58 }
  0xc3   :  { %v168_v60 = vpack.c.bf16 %v164_v59, %v163_v57 }
  0xc5   :  { %262 = vmatmul.bf16.gmra.mxu3 %v168_v60 }
 0x12c   :  { %v248_v1 = vpop.f32.mrf.mxu1 }
 0x12d   :  { %v249_v3 = vadd.f32 %v1171_v2, %v248_v1 }
 0x12f   :  { %v268_v5 = vmul.f32 0.2, %v249_v3 }
 0x131   :  { %v276_v8 = vmax.f32 %v249_v3, %v268_v5  ;;  %v1153_v3 = vld [vmem:[%s1700_s3 + $0x74] sm:$0xf0] }
 0x134   :  { %v250_v4 = vpop.f32.mrf.mxu1 }
 0x135   :  { %v251_v6 = vadd.f32 %v1171_v2, %v250_v4  ;;  %v1152_v4 = vld [vmem:[%s1700_s3 + $0x74] sm:$0xf] }
 0x137   :  { %v269_v7 = vmul.f32 0.2, %v251_v6 }
 0x138   :  { %v258_v12 = vpop.f32.mrf.mxu3 }
 0x139   :  { %v277_v9 = vmax.f32 %v251_v6, %v269_v7  ;;  %v259_v23 = vadd.f32 %v1171_v2, %v258_v12  ;;  %v1098_v6 = vld [vmem:[%s1700_s3 + $0x78] sm:$0xf0]  ;;  %v1088_v7 = vld [vmem:[%s1700_s3 + $0x60] sm:$0xf] }
 0x13b   :  { %v284_v10 = vpack.c.bf16 %v277_v9, %v276_v8  ;;  %v272_v27 = vmul.f32 0.2, %v259_v23  ;;  %v1151_v8 = vld [vmem:[%s1700_s3 + $0x64] sm:$0xf0]  ;;  %v1101_v9 = vor.u32 %v1152_v4, %v1098_v6  ;;  %v1173_v4 = vld [vmem:[%s1698_s2 + $0x3] ss:$0 sm:$0xff] }
 0x13c   :  { %v253_v11 = vpop.f32.mrf.mxu1  ;;  %v1089_v12 = vor.u32 %v1151_v8, %v1088_v7 }
 0x13d   :  { %366 = vmatmul.bf16.vlgmr.msrb.gmra.mxu2 %v284_v10  ;;  %v254_v13 = vadd.f32 %v1171_v2, %v253_v11  ;;  %v280_v30 = vmax.f32 %v259_v23, %v272_v27  ;;  %v1150_v10 = vld [vmem:[%s1700_s3 + $0x64] sm:$0xf]  ;;  %v1090_v11 = vld [vmem:[%s1700_s3 + $0x68] sm:$0xf0]  ;;  %657 = vmatpush.bf16.msrb.mxu1 %v1101_v9 }
 0x13e   :  { %v1074_v27 = vld [vmem:[%s1700_s3 + $0x48] sm:$0xf0] }
 0x13f   :  { %v270_v15 = vmul.f32 0.2, %v254_v13 }
 0x140   :  { %v260_v18 = vpop.f32.mrf.mxu3 }
 0x141   :  { %v278_v19 = vmax.f32 %v254_v13, %v270_v15  ;;  %v261_v24 = vadd.f32 %v1171_v2, %v260_v18  ;;  %v1080_v15 = vld [vmem:[%s1700_s3 + $0x50] sm:$0xf]  ;;  %v1082_v18 = vld [vmem:[%s1700_s3 + $0x58] sm:$0xf0] }
 0x143   :  { %v273_v28 = vmul.f32 0.2, %v261_v24 }
 0x144   :  { %v255_v14 = vpop.f32.mrf.mxu1 }
 0x145   :  { %v256_v16 = vadd.f32 %v1171_v2, %v255_v14  ;;  %v281_v31 = vmax.f32 %v261_v24, %v273_v28  ;;  %v1093_v14 = vor.u32 %v1150_v10, %v1090_v11  ;;  %v1072_v24 = vld [vmem:[%s1700_s3 + $0x40] sm:$0xf] }
 0x146   :  { %v1073_v29 = vor.u32 %v1147_v25, %v1072_v24 }
 0x147   :  { %v271_v17 = vmul.f32 0.2, %v256_v16  ;;  %v286_v33 = vpack.c.bf16 %v281_v31, %v280_v30  ;;  %658 = vmatpush.bf16.msrb.mxu1 %v1093_v14 }
 0x148   :  { %v263_v26 = vpop.f32.mrf.mxu3 }
 0x149   :  { %v279_v20 = vmax.f32 %v256_v16, %v271_v17  ;;  %v264_v35 = vadd.f32 %v1171_v2, %v263_v26  ;;  %v1149_v16 = vld [vmem:[%s1700_s3 + $0x54] sm:$0xf0]  ;;  %v1148_v17 = vld [vmem:[%s1700_s3 + $0x54] sm:$0xf]  ;;  %v1146_v26 = vld [vmem:[%s1700_s3 + $0x44] sm:$0xf] }
 0x14a   :  { %v1085_v23 = vor.u32 %v1148_v17, %v1082_v18  ;;  %v1077_v32 = vor.u32 %v1146_v26, %v1074_v27 }
 0x14b   :  { %v285_v21 = vpack.c.bf16 %v279_v20, %v278_v19  ;;  %v274_v37 = vmul.f32 0.2, %v264_v35  ;;  %v1081_v20 = vor.u32 %v1149_v16, %v1080_v15 }
 0x14c   :  { %659 = vmatpush.bf16.msrb.mxu1 %v1085_v23 }
 0x14d   :  { %371 = vmatmul.bf16.gmra.mxu2 %v285_v21  ;;  %v282_v39 = vmax.f32 %v264_v35, %v274_v37 }
 0x150   :  { %v265_v34 = vpop.f32.mrf.mxu3  ;;  %660 = vmatpush.bf16.msrb.mxu1 %v1077_v32 }
 0x151   :  { %v266_v36 = vadd.f32 %v1171_v2, %v265_v34  ;;  %v1096_v2 = vld [vmem:[%s1700_s3 + $0x70] sm:$0xf] }
 0x152   :  { %v1097_v5 = vor.u32 %v1153_v3, %v1096_v2 }
 0x153   :  { %v275_v38 = vmul.f32 0.2, %v266_v36 }
 0x154   :  { %628 = vmatpush.bf16.msrb.mxu0 %v1097_v5 }
 0x155   :  { %v283_v40 = vmax.f32 %v266_v36, %v275_v38 }
 0x157   :  { %v287_v41 = vpack.c.bf16 %v283_v40, %v282_v39 }
 0x158   :  { %629 = vmatpush.bf16.msrb.mxu0 %v1089_v12 }
 0x15c   :  { %630 = vmatpush.bf16.msrb.mxu0 %v1081_v20 }
 0x15d   :  { %376 = vmatmul.bf16.gmra.mxu2 %v286_v33 }
 0x160   :  { %631 = vmatpush.bf16.msrb.mxu0 %v1073_v29 }
 0x16d   :  { %381 = vmatmul.bf16.gmra.mxu2 %v287_v41 }
 0x1c0   :  { %v367_v46 = vpop.f32.mrf.mxu2 }
 0x1c1   :  { %v368_v48 = vadd.f32 %v1385_v47, %v367_v46  ;;  %v1065_v46 = vor.u32 %v1145_v44, %v1064_v43 }
 0x1c3   :  { %v387_v50 = vmul.f32 0.2, %v368_v48  ;;  %632 = vmatpush.bf16.msrb.mxu0 %v1065_v46 }
 0x1c5   :  { %v395_v53 = vmax.f32 %v368_v48, %v387_v50  ;;  %v1143_v50 = vld [vmem:[%s1700_s3 + $0x24] sm:$0xf0] }
 0x1c8   :  { %v369_v49 = vpop.f32.mrf.mxu2 }
 0x1c9   :  { %v370_v51 = vadd.f32 %v1385_v47, %v369_v49  ;;  %v1056_v49 = vld [vmem:[%s1700_s3 + $0x20] sm:$0xf] }
 0x1cb   :  { %v388_v52 = vmul.f32 0.2, %v370_v51 }
 0x1cd   :  { %v396_v54 = vmax.f32 %v370_v51, %v388_v52  ;;  %v1142_v51 = vld [vmem:[%s1700_s3 + $0x24] sm:$0xf]  ;;  %v1057_v52 = vor.u32 %v1143_v50, %v1056_v49  ;;  %v686_v49 = vlaneseq }
 0x1cf   :  { %v403_v55 = vpack.c.bf16 %v396_v54, %v395_v53  ;;  %v1058_v53 = vld [vmem:[%s1700_s3 + $0x28] sm:$0xf0]  ;;  %633 = vmatpush.bf16.msrb.mxu0 %v1057_v52  ;;  %v1503_v52 = vand.u32 127, %v686_v49 }
 0x1d0   :  { %v372_v56 = vpop.f32.mrf.mxu2  ;;  %v1061_v54 = vor.u32 %v1142_v51, %v1058_v53 }
 0x1d1   :  { %485 = vmatmul.bf16.vlgmr.msrb.gmra.mxu3 %v403_v55  ;;  %v373_v57 = vadd.f32 %v1385_v47, %v372_v56  ;;  %v1048_v55 = vld [vmem:[%s1700_s3 + $0x10] sm:$0xf]  ;;  %v1141_v56 = vld [vmem:[%s1700_s3 + $0x14] sm:$0xf0]  ;;  %vm771_vm0 = vcmp.lt.s32.totalorder %v1503_v52, 64  ;;  %vm773_vm1 = vcmp.lt.s32.totalorder %v1503_v52, 96 }
 0x1d3   :  { %v389_v59 = vmul.f32 0.2, %v373_v57 }
 0x1d5   :  { %v397_v62 = vmax.f32 %v373_v57, %v389_v59  ;;  %v1140_v57 = vld [vmem:[%s1700_s3 + $0x14] sm:$0xf]  ;;  %v1050_v59 = vld [vmem:[%s1700_s3 + $0x18] sm:$0xf0] }
 0x1d8   :  { %v374_v58 = vpop.f32.mrf.mxu2 }
 0x1d9   :  { %v375_v60 = vadd.f32 %v1385_v47, %v374_v58  ;;  %v1049_v58 = vor.u32 %v1141_v56, %v1048_v55 }
 0x1db   :  { %v390_v61 = vmul.f32 0.2, %v375_v60  ;;  %634 = vmatpush.bf16.msrb.mxu0 %v1049_v58 }
 0x1dd   :  { %v398_v63 = vmax.f32 %v375_v60, %v390_v61  ;;  %v1053_v60 = vor.u32 %v1140_v57, %v1050_v59  ;;  %v1040_v61 = vld [vmem:[%s1700_s3] sm:$0xf]  ;;  %v688_v59 = vadd.s32 128, %v1503_v52 }
 0x1df   :  { %v404_v0 = vpack.c.bf16 %v398_v63, %v397_v62  ;;  %v1139_v62 = vld [vmem:[%s1700_s3 + $0x4] sm:$0xf0]  ;;  %v1138_v63 = vld [vmem:[%s1700_s3 + $0x4] sm:$0xf] }
 0x1e0   :  { %v377_v1 = vpop.f32.mrf.mxu2 }
 0x1e1   :  { %490 = vmatmul.bf16.gmra.mxu3 %v404_v0  ;;  %v378_v13 = vadd.f32 %v1385_v47, %v377_v1  ;;  %v1041_v0 = vor.u32 %v1139_v62, %v1040_v61  ;;  %v1042_v1 = vld [vmem:[%s1700_s3 + $0x8] sm:$0xf0] }
 0x1e2   :  { %v1045_v2 = vor.u32 %v1138_v63, %v1042_v1 }
 0x1e3   :  { %v391_v21 = vmul.f32 0.2, %v378_v13  ;;  %635 = vmatpush.bf16.msrb.mxu0 %v1041_v0 }
 0x1e5   :  { %v399_v30 = vmax.f32 %v378_v13, %v391_v21 }
 0x1e8   :  { %v379_v19 = vpop.f32.mrf.mxu2 }
 0x1e9   :  { %v380_v22 = vadd.f32 %v1385_v47, %v379_v19 }
 0x1eb   :  { %v392_v28 = vmul.f32 0.2, %v380_v22 }
 0x1ed   :  { %v400_v31 = vmax.f32 %v380_v22, %v392_v28 }
 0x1ef   :  { %v405_v33 = vpack.c.bf16 %v400_v31, %v399_v30 }
 0x1f0   :  { %v382_v34 = vpop.f32.mrf.mxu2 }
 0x1f1   :  { %495 = vmatmul.bf16.gmra.mxu3 %v405_v33  ;;  %v383_v35 = vadd.f32 %v1385_v47, %v382_v34 }
 0x1f3   :  { %v393_v37 = vmul.f32 0.2, %v383_v35 }
 0x1f5   :  { %v401_v40 = vmax.f32 %v383_v35, %v393_v37 }
 0x1f8   :  { %v384_v36 = vpop.f32.mrf.mxu2 }
 0x1f9   :  { %v385_v38 = vadd.f32 %v1385_v47, %v384_v36  ;;  %v1066_v47 = vld [vmem:[%s1700_s3 + $0x38] sm:$0xf0] }
 0x1fa   :  { %v1069_v48 = vor.u32 %v1144_v45, %v1066_v47 }
 0x1fb   :  { %v394_v39 = vmul.f32 0.2, %v385_v38 }
 0x1fc   :  { %661 = vmatpush.bf16.msrb.mxu1 %v1069_v48 }
 0x1fd   :  { %v402_v41 = vmax.f32 %v385_v38, %v394_v39 }
 0x1ff   :  { %v406_v42 = vpack.c.bf16 %v402_v41, %v401_v40  ;;  %v542_v40 = vld [vmem:[%s1701_s4] sm:$0x3] }
 0x200   :  { %662 = vmatpush.bf16.msrb.mxu1 %v1061_v54  ;;  %v1497_v41 = vperm.slane %v542_v40, 0 }
 0x201   :  { %500 = vmatmul.bf16.gmra.mxu3 %v406_v42  ;;  %v1499_v42 = vperm.slane %v542_v40, 1 }
 0x204   :  { %663 = vmatpush.bf16.msrb.mxu1 %v1053_v60 }
 0x208   :  { %664 = vmatpush.bf16.msrb.mxu1 %v1045_v2  ;;  %v690_v2 = vand.u32 127, %v688_v59 }
 0x20a   :  { %vm1524_vm2 = vcmp.lt.s32.totalorder %v690_v2, 96  ;;  %vm1528_vm3 = vcmp.lt.s32.totalorder %v690_v2, 64 }
 0x254   :  { %v486_v3 = vpop.f32.mrf.mxu3 }
 0x255   :  { %v487_v5 = vadd.f32 %v1173_v4, %v486_v3 }
 0x257   :  { %v506_v7 = vmul.f32 0.2, %v487_v5 }
 0x259   :  { %v514_v10 = vmax.f32 %v487_v5, %v506_v7 }
 0x25c   :  { %v488_v6 = vpop.f32.mrf.mxu3 }
 0x25d   :  { %v489_v8 = vadd.f32 %v1173_v4, %v488_v6 }
 0x25f   :  { %v507_v9 = vmul.f32 0.2, %v489_v8 }
 0x261   :  { %v515_v11 = vmax.f32 %v489_v8, %v507_v9 }
 0x263   :  { %v522_v12 = vpack.c.bf16 %v515_v11, %v514_v10 }
 0x264   :  { %v491_v13 = vpop.f32.mrf.mxu3 }
 0x265   :  { %636 = vmatmul.bf16.vlgmr.msrb.gmra.mxu0 %v522_v12  ;;  %665 = vmatmul.bf16.vlgmr.msrb.gmra.mxu1 %v522_v12  ;;  %v492_v14 = vadd.f32 %v1173_v4, %v491_v13 }
 0x267   :  { %v508_v16 = vmul.f32 0.2, %v492_v14 }
 0x269   :  { %v516_v19 = vmax.f32 %v492_v14, %v508_v16 }
 0x26c   :  { %v493_v15 = vpop.f32.mrf.mxu3 }
 0x26d   :  { %v494_v17 = vadd.f32 %v1173_v4, %v493_v15 }
 0x26f   :  { %v509_v18 = vmul.f32 0.2, %v494_v17 }
 0x271   :  { %v517_v20 = vmax.f32 %v494_v17, %v509_v18 }
 0x273   :  { %v523_v21 = vpack.c.bf16 %v517_v20, %v516_v19 }
 0x274   :  { %v496_v22 = vpop.f32.mrf.mxu3 }
 0x275   :  { %641 = vmatmul.bf16.gmra.mxu0 %v523_v21  ;;  %670 = vmatmul.bf16.gmra.mxu1 %v523_v21  ;;  %v497_v23 = vadd.f32 %v1173_v4, %v496_v22 }
 0x277   :  { %v510_v25 = vmul.f32 0.2, %v497_v23 }
 0x279   :  { %v518_v28 = vmax.f32 %v497_v23, %v510_v25 }
 0x27c   :  { %v498_v24 = vpop.f32.mrf.mxu3 }
 0x27d   :  { %v499_v26 = vadd.f32 %v1173_v4, %v498_v24 }
 0x27f   :  { %v511_v27 = vmul.f32 0.2, %v499_v26 }
 0x281   :  { %v519_v29 = vmax.f32 %v499_v26, %v511_v27 }
 0x283   :  { %v524_v30 = vpack.c.bf16 %v519_v29, %v518_v28 }
 0x284   :  { %v501_v31 = vpop.f32.mrf.mxu3 }
 0x285   :  { %646 = vmatmul.bf16.gmra.mxu0 %v524_v30  ;;  %675 = vmatmul.bf16.gmra.mxu1 %v524_v30  ;;  %v502_v32 = vadd.f32 %v1173_v4, %v501_v31 }
 0x287   :  { %v512_v34 = vmul.f32 0.2, %v502_v32 }
 0x289   :  { %v520_v37 = vmax.f32 %v502_v32, %v512_v34 }
 0x28c   :  { %v503_v33 = vpop.f32.mrf.mxu3 }
 0x28d   :  { %v504_v35 = vadd.f32 %v1173_v4, %v503_v33 }
 0x28f   :  { %v513_v36 = vmul.f32 0.2, %v504_v35 }
 0x291   :  { %v521_v38 = vmax.f32 %v504_v35, %v513_v36 }
 0x293   :  { %v525_v39 = vpack.c.bf16 %v521_v38, %v520_v37 }
 0x295   :  { %651 = vmatmul.bf16.gmra.mxu0 %v525_v39  ;;  %680 = vmatmul.bf16.gmra.mxu1 %v525_v39 }
 0x2e2   :  { %v637_v43 = vpop.f32.mrf.mxu0  ;;  %v666_v44 = vpop.f32.mrf.mxu1 }
 0x2e3   :  { %v638_v45 = vadd.f32 %v637_v43, %v1497_v41  ;;  %v667_v46 = vadd.f32 %v666_v44, %v1499_v42 }
 0x2e5   :  { %v691_v47 = vsub.f32 0.0, %v638_v45  ;;  %v692_v48 = vsub.f32 0.0, %v667_v46  ;;  %v775_v11 = vand.u32 2147483647, %v638_v45  ;;  %v776_v16 = vand.u32 2147483647, %v667_v46 }
 0x2e7   :  { %v707_v50 = vmul.f32 1.442695, %v691_v47  ;;  %v709_v51 = vmul.f32 1.442695, %v692_v48 }
 0x2e9   :  { %1174 = vpow2.f32 %v707_v50 }
 0x2ea   :  { %1176 = vpow2.f32 %v709_v51  ;;  %v639_v53 = vpop.f32.mrf.mxu0  ;;  %v668_v54 = vpop.f32.mrf.mxu1 }
 0x2eb   :  { %v1506_v55 = vadd.f32 %v639_v53, %v1497_v41  ;;  %v1509_v56 = vadd.f32 %v668_v54, %v1499_v42 }
 0x2ed   :  { %v693_v57 = vsub.f32 0.0, %v1506_v55  ;;  %v694_v58 = vsub.f32 0.0, %v1509_v56  ;;  %v777_v32 = vand.u32 2147483647, %v1506_v55  ;;  %v778_v40 = vand.u32 2147483647, %v1509_v56 }
 0x2ef   :  { %v1175_v60 = vpop.eup %1174  ;;  %v711_v61 = vmul.f32 1.442695, %v693_v57  ;;  %v713_v0 = vmul.f32 1.442695, %v694_v58 }
 0x2f0   :  { %v1177_v62 = vpop.eup %1176  ;;  %v739_v63 = vadd.f32 1.0, %v1175_v60 }
 0x2f1   :  { %v740_v1 = vadd.f32 1.0, %v1177_v62  ;;  %1178 = vpow2.f32 %v711_v61 }
 0x2f2   :  { %1180 = vrcp.f32 %v739_v63  ;;  %v642_v3 = vpop.f32.mrf.mxu0  ;;  %v671_v4 = vpop.f32.mrf.mxu1 }
 0x2f3   :  { %1182 = vrcp.f32 %v740_v1  ;;  %v1515_v5 = vadd.f32 %v642_v3, %v1497_v41  ;;  %v1518_v6 = vadd.f32 %v671_v4, %v1499_v42 }
 0x2f4   :  { %1184 = vpow2.f32 %v713_v0 }
 0x2f5   :  { %v695_v7 = vsub.f32 0.0, %v1515_v5  ;;  %v696_v8 = vsub.f32 0.0, %v1518_v6 }
 0x2f7   :  { %v1179_v10 = vpop.eup %1178  ;;  %v715_v12 = vmul.f32 1.442695, %v695_v7  ;;  %v717_v13 = vmul.f32 1.442695, %v696_v8 }
 0x2f8   :  { %v1181_v14 = vpop.eup %1180  ;;  %v741_v17 = vadd.f32 1.0, %v1179_v10 }
 0x2f9   :  { %v1183_v18 = vpop.eup %1182  ;;  %v791_v19 = vsel %vm773_vm1, %v1181_v14, %v775_v11  ;;  %1186 = vpow2.f32 %v715_v12 }
 0x2fa   :  { %v1185_v20 = vpop.eup %1184  ;;  %v807_v21 = vsel %vm771_vm0, %v638_v45, %v791_v19  ;;  %v792_v22 = vsel %vm1524_vm2, %v1183_v18, %v776_v16  ;;  %1188 = vrcp.f32 %v741_v17  ;;  %v644_v23 = vpop.f32.mrf.mxu0 }
 0x2fb   :  { %v673_v24 = vpop.f32.mrf.mxu1  ;;  %823 = vst [vmem:[%s1702_s5] sm:$0xff] %v807_v21  ;;  %v808_v25 = vsel %vm1528_vm3, %v667_v46, %v792_v22  ;;  %v742_v26 = vadd.f32 1.0, %v1185_v20  ;;  %1190 = vpow2.f32 %v717_v13  ;;  %v1544_v27 = vadd.f32 %v644_v23, %v1497_v41 }
 0x2fc   :  { %824 = vst [vmem:[%s1702_s5 + $0x8] sm:$0xff] %v808_v25  ;;  %v1550_v28 = vadd.f32 %v673_v24, %v1499_v42 }
 0x2fd   :  { %1192 = vrcp.f32 %v742_v26  ;;  %v697_v29 = vsub.f32 0.0, %v1544_v27  ;;  %v781_v13 = vand.u32 2147483647, %v1544_v27 }
 0x2fe   :  { %v698_v30 = vsub.f32 0.0, %v1550_v28  ;;  %v782_v20 = vand.u32 2147483647, %v1550_v28 }
 0x2ff   :  { %v1187_v31 = vpop.eup %1186  ;;  %v719_v33 = vmul.f32 1.442695, %v697_v29 }
 0x300   :  { %v1189_v34 = vpop.eup %1188  ;;  %v743_v35 = vadd.f32 1.0, %v1187_v31  ;;  %v721_v36 = vmul.f32 1.442695, %v698_v30 }
 0x301   :  { %v1191_v37 = vpop.eup %1190  ;;  %v793_v38 = vsel %vm773_vm1, %v1189_v34, %v777_v32  ;;  %1194 = vpow2.f32 %v719_v33 }
 0x302   :  { %v809_v39 = vsel %vm771_vm0, %v1506_v55, %v793_v38  ;;  %1196 = vrcp.f32 %v743_v35  ;;  %v744_v43 = vadd.f32 1.0, %v1191_v37  ;;  %v647_v44 = vpop.f32.mrf.mxu0  ;;  %v779_v55 = vand.u32 2147483647, %v1515_v5 }
 0x303   :  { %v676_v45 = vpop.f32.mrf.mxu1  ;;  %v1193_v46 = vpop.eup %1192  ;;  %825 = vst [vmem:[%s1702_s5 + $0x10] sm:$0xff] %v809_v39  ;;  %1198 = vpow2.f32 %v721_v36  ;;  %v1565_v47 = vadd.f32 %v647_v44, %v1497_v41 }
 0x304   :  { %v1568_v48 = vadd.f32 %v676_v45, %v1499_v42  ;;  %v794_v49 = vsel %vm1524_vm2, %v1193_v46, %v778_v40  ;;  %1200 = vrcp.f32 %v744_v43 }
 0x305   :  { %v810_v50 = vsel %vm1528_vm3, %v1509_v56, %v794_v49  ;;  %v699_v51 = vsub.f32 0.0, %v1565_v47  ;;  %v780_v56 = vand.u32 2147483647, %v1518_v6  ;;  %v783_v34 = vand.u32 2147483647, %v1565_v47 }
 0x306   :  { %v700_v53 = vsub.f32 0.0, %v1568_v48  ;;  %826 = vst [vmem:[%s1702_s5 + $0x18] sm:$0xff] %v810_v50 }
 0x307   :  { %v1195_v54 = vpop.eup %1194  ;;  %v723_v57 = vmul.f32 1.442695, %v699_v51 }
 0x308   :  { %v725_v58 = vmul.f32 1.442695, %v700_v53  ;;  %v1197_v59 = vpop.eup %1196  ;;  %v745_v60 = vadd.f32 1.0, %v1195_v54 }
 0x309   :  { %v1199_v61 = vpop.eup %1198  ;;  %v795_v62 = vsel %vm773_vm1, %v1197_v59, %v779_v55  ;;  %1202 = vpow2.f32 %v723_v57 }
 0x30a   :  { %v1201_v63 = vpop.eup %1200  ;;  %v811_v0 = vsel %vm771_vm0, %v1515_v5, %v795_v62  ;;  %1204 = vrcp.f32 %v745_v60  ;;  %v746_v1 = vadd.f32 1.0, %v1199_v61  ;;  %v649_v2 = vpop.f32.mrf.mxu0 }
 0x30b   :  { %v678_v3 = vpop.f32.mrf.mxu1  ;;  %827 = vst [vmem:[%s1702_s5 + $0x20] sm:$0xff] %v811_v0  ;;  %v796_v4 = vsel %vm1524_vm2, %v1201_v63, %v780_v56  ;;  %1206 = vpow2.f32 %v725_v58  ;;  %v1593_v7 = vadd.f32 %v649_v2, %v1497_v41 }
 0x30c   :  { %v1596_v8 = vadd.f32 %v678_v3, %v1499_v42  ;;  %v812_v5 = vsel %vm1528_vm3, %v1518_v6, %v796_v4  ;;  %1208 = vrcp.f32 %v746_v1 }
 0x30d   :  { %828 = vst [vmem:[%s1702_s5 + $0x28] sm:$0xff] %v812_v5  ;;  %v701_v10 = vsub.f32 0.0, %v1593_v7  ;;  %v785_v58 = vand.u32 2147483647, %v1593_v7 }
 0x30e   :  { %v702_v11 = vsub.f32 0.0, %v1596_v8 }
 0x30f   :  { %v1203_v12 = vpop.eup %1202  ;;  %v727_v14 = vmul.f32 1.442695, %v701_v10 }
 0x310   :  { %v729_v16 = vmul.f32 1.442695, %v702_v11  ;;  %v1205_v17 = vpop.eup %1204  ;;  %v747_v18 = vadd.f32 1.0, %v1203_v12 }
 0x311   :  { %v1207_v19 = vpop.eup %1206  ;;  %v797_v6 = vsel %vm773_vm1, %v1205_v17, %v781_v13  ;;  %1210 = vpow2.f32 %v727_v14 }
 0x312   :  { %v1209_v21 = vpop.eup %1208  ;;  %v813_v22 = vsel %vm771_vm0, %v1544_v27, %v797_v6  ;;  %1212 = vrcp.f32 %v747_v18  ;;  %v748_v23 = vadd.f32 1.0, %v1207_v19  ;;  %v652_v24 = vpop.f32.mrf.mxu0 }
 0x313   :  { %v681_v25 = vpop.f32.mrf.mxu1  ;;  %829 = vst [vmem:[%s1702_s5 + $0x30] sm:$0xff] %v813_v22  ;;  %v798_v26 = vsel %vm1524_vm2, %v1209_v21, %v782_v20  ;;  %1214 = vpow2.f32 %v729_v16  ;;  %v653_v29 = vadd.f32 %v652_v24, %v1497_v41 }
 0x314   :  { %v1620_v30 = vadd.f32 %v681_v25, %v1499_v42  ;;  %v814_v27 = vsel %vm1528_vm3, %v1550_v28, %v798_v26  ;;  %1216 = vrcp.f32 %v748_v23  ;;  %v784_v28 = vand.u32 2147483647, %v1568_v48 }
 0x315   :  { %830 = vst [vmem:[%s1702_s5 + $0x38] sm:$0xff] %v814_v27  ;;  %v703_v31 = vsub.f32 0.0, %v653_v29  ;;  %v787_v4 = vand.u32 2147483647, %v653_v29 }
 0x316   :  { %v704_v32 = vsub.f32 0.0, %v1620_v30  ;;  %v788_v12 = vand.u32 2147483647, %v1620_v30 }
 0x317   :  { %v1211_v33 = vpop.eup %1210  ;;  %v731_v35 = vmul.f32 1.442695, %v703_v31 }
 0x318   :  { %v733_v36 = vmul.f32 1.442695, %v704_v32  ;;  %v1213_v37 = vpop.eup %1212  ;;  %v749_v38 = vadd.f32 1.0, %v1211_v33 }
 0x319   :  { %v1215_v39 = vpop.eup %1214  ;;  %v799_v40 = vsel %vm773_vm1, %v1213_v37, %v783_v34  ;;  %1218 = vpow2.f32 %v731_v35 }
 0x31a   :  { %v1217_v43 = vpop.eup %1216  ;;  %v815_v44 = vsel %vm771_vm0, %v1565_v47, %v799_v40  ;;  %1220 = vrcp.f32 %v749_v38  ;;  %v750_v45 = vadd.f32 1.0, %v1215_v39  ;;  %v654_v46 = vpop.f32.mrf.mxu0 }
 0x31b   :  { %v683_v49 = vpop.f32.mrf.mxu1  ;;  %831 = vst [vmem:[%s1702_s5 + $0x40] sm:$0xff] %v815_v44  ;;  %v800_v50 = vsel %vm1524_vm2, %v1217_v43, %v784_v28  ;;  %1222 = vpow2.f32 %v733_v36  ;;  %v655_v51 = vadd.f32 %v654_v46, %v1497_v41 }
 0x31c   :  { %v684_v53 = vadd.f32 %v683_v49, %v1499_v42  ;;  %v816_v47 = vsel %vm1528_vm3, %v1568_v48, %v800_v50  ;;  %1224 = vrcp.f32 %v750_v45  ;;  %v786_v48 = vand.u32 2147483647, %v1596_v8 }
 0x31d   :  { %832 = vst [vmem:[%s1702_s5 + $0x48] sm:$0xff] %v816_v47  ;;  %v705_v54 = vsub.f32 0.0, %v655_v51  ;;  %v789_v18 = vand.u32 2147483647, %v655_v51 }
 0x31e   :  { %v706_v55 = vsub.f32 0.0, %v684_v53  ;;  %v790_v20 = vand.u32 2147483647, %v684_v53 }
 0x31f   :  { %v1219_v57 = vpop.eup %1218  ;;  %v735_v59 = vmul.f32 1.442695, %v705_v54 }
 0x320   :  { %v737_v60 = vmul.f32 1.442695, %v706_v55  ;;  %v1221_v61 = vpop.eup %1220  ;;  %v751_v41 = vadd.f32 1.0, %v1219_v57 }
 0x321   :  { %v1223_v62 = vpop.eup %1222  ;;  %v801_v42 = vsel %vm773_vm1, %v1221_v61, %v785_v58  ;;  %1226 = vpow2.f32 %v735_v59 }
 0x322   :  { %v1225_v56 = vpop.eup %1224  ;;  %v817_v63 = vsel %vm771_vm0, %v1593_v7, %v801_v42  ;;  %1228 = vrcp.f32 %v751_v41  ;;  %v752_v0 = vadd.f32 1.0, %v1223_v62 }
 0x323   :  { %833 = vst [vmem:[%s1702_s5 + $0x50] sm:$0xff] %v817_v63  ;;  %v802_v1 = vsel %vm1524_vm2, %v1225_v56, %v786_v48  ;;  %1230 = vpow2.f32 %v737_v60 }
 0x324   :  { %v818_v2 = vsel %vm1528_vm3, %v1596_v8, %v802_v1  ;;  %1232 = vrcp.f32 %v752_v0 }
 0x325   :  { %834 = vst [vmem:[%s1702_s5 + $0x58] sm:$0xff] %v818_v2 }
 0x327   :  { %v1227_v3 = vpop.eup %1226 }
 0x328   :  { %v1229_v7 = vpop.eup %1228  ;;  %v753_v5 = vadd.f32 1.0, %v1227_v3 }
 0x329   :  { %v1231_v10 = vpop.eup %1230  ;;  %v803_v11 = vsel %vm773_vm1, %v1229_v7, %v787_v4 }
 0x32a   :  { %v1233_v13 = vpop.eup %1232  ;;  %v819_v14 = vsel %vm771_vm0, %v653_v29, %v803_v11  ;;  %1234 = vrcp.f32 %v753_v5  ;;  %v754_v8 = vadd.f32 1.0, %v1231_v10 }
 0x32b   :  { %835 = vst [vmem:[%s1702_s5 + $0x60] sm:$0xff] %v819_v14  ;;  %v804_v16 = vsel %vm1524_vm2, %v1233_v13, %v788_v12 }
 0x32c   :  { %v820_v17 = vsel %vm1528_vm3, %v1620_v30, %v804_v16  ;;  %1236 = vrcp.f32 %v754_v8 }
 0x32d   :  { %836 = vst [vmem:[%s1702_s5 + $0x68] sm:$0xff] %v820_v17 }
 0x330   :  { %v1235_v19 = vpop.eup %1234 }
 0x331   :  { %v805_v6 = vsel %vm773_vm1, %v1235_v19, %v789_v18 }
 0x332   :  { %v1237_v21 = vpop.eup %1236  ;;  %v821_v22 = vsel %vm771_vm0, %v655_v51, %v805_v6 }
 0x333   :  { %837 = vst [vmem:[%s1702_s5 + $0x70] sm:$0xff] %v821_v22  ;;  %v806_v23 = vsel %vm1524_vm2, %v1237_v21, %v790_v20 }
 0x334   :  { %v822_v24 = vsel %vm1528_vm3, %v684_v53, %v806_v23 }
 0x335   :  { %838 = vst [vmem:[%s1702_s5 + $0x78] sm:$0xff] %v822_v24 }

</bundles_post_ra>
